<compile_context>
chip_gen: v7x
topology: tpu7x:2x2x1
jax: 0.10.0
libtpu: 0.0.40
codegen_flags: <defaults>
</compile_context>

<pallas_src>
import functools

import jax
import jax.numpy as jnp
from jax.experimental import pallas as pl
from jax.experimental.pallas import tpu as pltpu


def _round_up(n, m):
    return ((n + m - 1) // m) * m


def _label_smoothing_kernel(x_ref, xtgt_ref, out_ref, *, confidence, smoothing,
                            true_b, block_rows, tgt_resident):
    # x_ref:    (TB, C) logits in native dtype (cast to f32 on load).
    # xtgt_ref: gathered target logits x[b, target[b]] as f32:
    #             resident mode: (B_pad, 1) full array, sliced with pl.ds
    #             blocked mode : (TB, 1) per-tile block
    # out_ref:  (1, 8, 128) f32 per-tile partial-sum slab (lane-dense store).
    i = pl.program_id(0)

    x = x_ref[...].astype(jnp.float32)                          # (TB, C)
    _, c = x.shape

    # Numerically stable pieces; logprobs = z - lse is never materialized.
    m = jnp.max(x, axis=-1, keepdims=True)                      # (TB, 1)  XLU
    z = x - m                                                   # (TB, C)  VPU
    lse = jnp.log(jnp.sum(jnp.exp(z), axis=-1, keepdims=True))  # (TB, 1)  EUP+XLU
    sum_z = jnp.sum(z, axis=-1, keepdims=True)                  # (TB, 1)  XLU

    if tgt_resident:
        start = pl.multiple_of(i * block_rows, block_rows)
        x_tgt = xtgt_ref[pl.ds(start, block_rows), :]           # (TB, 1)
    else:
        x_tgt = xtgt_ref[...]                                   # (TB, 1)

    # loss_row = conf*(lse - (x_tgt - m)) + smooth*(lse - sum_z/C)
    #          = lse - conf*(x_tgt - m) - (smooth/C)*sum_z      (conf+smooth = 1)
    loss = lse - confidence * (x_tgt - m) - (smoothing / c) * sum_z   # (TB, 1)

    # Mask padded tail rows (global row >= true batch size) with a select so
    # any Inf/NaN garbage in block padding cannot propagate into the sum.
    row = jax.lax.broadcasted_iota(jnp.int32, loss.shape, 0) + i * block_rows
    loss = jnp.where(row < true_b, loss, 0.0)

    tile_sum = jnp.sum(loss)
    out_ref[...] = jnp.broadcast_to(tile_sum, out_ref.shape).astype(out_ref.dtype)


def label_smoothing_loss(x, target, smoothing=0.1, block_rows=None):
    """Pallas equivalent of LabelSmoothing.forward(x, target)."""
    B, C = x.shape
    confidence = 1.0 - smoothing

    itemsize = jnp.dtype(x.dtype).itemsize
    # Sublane packing of the native dtype: 8 rows (f32), 16 (bf16), 32 (int8/fp8).
    align = max(8, 32 // max(itemsize, 1))

    # Generation-aware VMEM budget (128 MiB on v5e/v6e, 64 MiB on v7x).
    try:
        vmem_cap = int(pltpu.get_tpu_info().vmem_capacity_bytes)
    except Exception:
        vmem_cap = 64 * 1024 * 1024
    vmem_limit = int(min((vmem_cap * 3) // 4, 96 * 1024 * 1024))

    if block_rows is None:
        # Live footprint per step ~= 2x native tile (double-buffered input)
        # + ~4x f32-tile of temporaries (f32 cast, z, exp(z), slack).  Spend
        # half the scoped-VMEM limit on that; the rest is headroom for the
        # output slab, the resident side input and the scheduler.
        bytes_per_row = 2 * C * itemsize + 4 * C * 4
        block_rows = max(align, (vmem_limit // 2) // max(bytes_per_row, 1))
    block_rows = max(align, (block_rows // align) * align)   # sublane multiple
    block_rows = min(block_rows, _round_up(B, align))        # don't exceed batch
    num_tiles = pl.cdiv(B, block_rows)
    b_pad = num_tiles * block_rows

    # Hoist the target gather out of the kernel: x_tgt[b] = x[b, target[b]].
    # This is a trivial XLA op on B*4 bytes and removes the dense iota/where
    # /coef*z path from the kernel entirely.
    x_tgt = jnp.take_along_axis(
        x, target.reshape(B, 1).astype(jnp.int32), axis=-1).astype(jnp.float32)
    x_tgt = jnp.pad(x_tgt, ((0, b_pad - B), (0, 0)))          # (B_pad, 1)

    # Keep the tiny per-row side input VMEM-resident (single DMA, constant
    # index_map) unless the batch is huge; lane-padded it costs ~512 B/row.
    tgt_resident = (b_pad * 512) <= min(4 * 1024 * 1024, vmem_limit // 8)
    if tgt_resident:
        xtgt_spec = pl.BlockSpec((b_pad, 1), lambda i: (0, 0))
    else:
        xtgt_spec = pl.BlockSpec((block_rows, 1), lambda i: (i, 0))

    kernel = functools.partial(
        _label_smoothing_kernel,
        confidence=float(confidence),
        smoothing=float(smoothing),
        true_b=B,
        block_rows=block_rows,
        tgt_resident=tgt_resident,
    )

    partials = pl.pallas_call(
        kernel,
        out_shape=jax.ShapeDtypeStruct((num_tiles, 8, 128), jnp.float32),
        grid=(num_tiles,),
        in_specs=[
            pl.BlockSpec((block_rows, C), lambda i: (i, 0)),   # x tile
            xtgt_spec,                                         # gathered x[b, tgt[b]]
        ],
        # One independent (8,128)-aligned lane-dense partial-sum block per tile
        # so the batch axis can be marked "parallel" (both TCs on v7x).
        out_specs=pl.BlockSpec((1, 8, 128), lambda i: (i, 0, 0)),
        compiler_params=pltpu.CompilerParams(
            dimension_semantics=("parallel",),
            vmem_limit_bytes=vmem_limit,
        ),
    )(x, x_tgt)

    # Per-tile partial sums live at [:, 0, 0]; final mean over the true B.
    return jnp.sum(partials[:, 0, 0]) / B


def _reference(x, target, smoothing=0.1):
    confidence = 1.0 - smoothing
    logprobs = jax.nn.log_softmax(x.astype(jnp.float32), axis=-1)
    nll = -jnp.take_along_axis(
        logprobs, target[:, None].astype(jnp.int32), axis=-1)[:, 0]
    smooth = -jnp.mean(logprobs, axis=-1)
    return jnp.mean(confidence * nll + smoothing * smooth)


if __name__ == "__main__":
    key = jax.random.PRNGKey(0)
    kx, kt = jax.random.split(key)

    # Small shapes; B=13 is deliberately not a multiple of the tile so the
    # tail-row masking path is exercised.
    B, C = 13, 32
    x = jax.random.normal(kx, (B, C), dtype=jnp.float32)
    target = jax.random.randint(kt, (B,), 0, C, dtype=jnp.int32)

    ref = _reference(x, target, smoothing=0.1)

    # Multi-tile path (2 grid steps, masked tail tile, dynamic pl.ds slice).
    loss_tiled = jax.block_until_ready(
        label_smoothing_loss(x, target, smoothing=0.1, block_rows=8))
    assert jnp.allclose(loss_tiled, ref, atol=2e-5, rtol=1e-5), (loss_tiled, ref)

    # Auto (generation-aware) tile-size path.
    loss_auto = jax.block_until_ready(label_smoothing_loss(x, target, smoothing=0.1))
    assert jnp.allclose(loss_auto, ref, atol=2e-5, rtol=1e-5), (loss_auto, ref)

    # bf16 logits exercise the 16-row sublane-packing alignment path.
    xb = x.astype(jnp.bfloat16)
    refb = _reference(xb, target, smoothing=0.1)
    loss_bf16 = jax.block_until_ready(label_smoothing_loss(xb, target, smoothing=0.1))
    assert jnp.allclose(loss_bf16, refb, atol=1e-4, rtol=1e-4), (loss_bf16, refb)

    print("KERNEL_OK")
</pallas_src>

<mosaic_0001>
module attributes {stable_mosaic.version = 11 : i64} {
  func.func @_label_smoothing_kernel(%arg0: i32, %arg1: memref<8x32xf32, #tpu.memory_space<vmem>>, %arg2: memref<16x1xf32, #tpu.memory_space<vmem>>, %arg3: memref<1x8x128xf32, #tpu.memory_space<vmem>>) attributes {dimension_semantics = [#tpu.dimension_semantics<parallel>], iteration_bounds = array<i64: 2>, scalar_prefetch = 0 : i64, scratch_operands = 0 : i64, tpu.core_type = #tpu.core_type<tc>, window_params = [{transform_indices = @transform_0, window_bounds = array<i64: 8, 32>}, {pipeline_mode = #tpu.pipeline_mode<synchronous>, transform_indices = @transform_1, window_bounds = array<i64: 16, 1>}, {transform_indices = @transform_2, window_bounds = array<i64: 1, 8, 128>}]} {
    %c0 = arith.constant 0 : index
    %c0_0 = arith.constant 0 : index
    %0 = vector.load %arg1[%c0, %c0_0] : memref<8x32xf32, #tpu.memory_space<vmem>>, vector<8x32xf32>
    %cst = arith.constant dense<0xFF800000> : vector<8xf32>
    %1 = vector.multi_reduction <maximumf>, %0, %cst [1] : vector<8x32xf32> to vector<8xf32>
    %2 = vector.shape_cast %1 : vector<8xf32> to vector<8x1xf32>
    %3 = vector.broadcast %2 : vector<8x1xf32> to vector<8x32xf32>
    %4 = arith.subf %0, %3 : vector<8x32xf32>
    %5 = math.exp %4 : vector<8x32xf32>
    %cst_1 = arith.constant dense<0.000000e+00> : vector<8xf32>
    %6 = vector.multi_reduction <add>, %5, %cst_1 [1] : vector<8x32xf32> to vector<8xf32>
    %7 = vector.shape_cast %6 : vector<8xf32> to vector<8x1xf32>
    %8 = math.log %7 : vector<8x1xf32>
    %cst_2 = arith.constant dense<0.000000e+00> : vector<8xf32>
    %9 = vector.multi_reduction <add>, %4, %cst_2 [1] : vector<8x32xf32> to vector<8xf32>
    %10 = vector.shape_cast %9 : vector<8xf32> to vector<8x1xf32>
    %c8_i32 = arith.constant 8 : i32
    %11 = arith.muli %arg0, %c8_i32 : i32
    %12 = tpu.assume_multiple %11, 8 : i32
    %13 = arith.index_cast %12 : i32 to index
    %c0_3 = arith.constant 0 : index
    %14 = vector.load %arg2[%13, %c0_3] : memref<16x1xf32, #tpu.memory_space<vmem>>, vector<8x1xf32>
    %15 = arith.subf %14, %2 : vector<8x1xf32>
    %cst_4 = arith.constant 0.899999976 : f32
    %16 = vector.broadcast %cst_4 : f32 to vector<8x1xf32>
    %17 = arith.mulf %16, %15 : vector<8x1xf32>
    %18 = arith.subf %8, %17 : vector<8x1xf32>
    %cst_5 = arith.constant 3.125000e-03 : f32
    %19 = vector.broadcast %cst_5 : f32 to vector<8x1xf32>
    %20 = arith.mulf %19, %10 : vector<8x1xf32>
    %21 = arith.subf %18, %20 : vector<8x1xf32>
    %22 = tpu.iota {dimensions = array<i32: 0>} : vector<8x1xi32>
    %c8_i32_6 = arith.constant 8 : i32
    %23 = arith.muli %arg0, %c8_i32_6 : i32
    %24 = vector.broadcast %23 : i32 to vector<8x1xi32>
    %25 = arith.addi %22, %24 : vector<8x1xi32>
    %c13_i32 = arith.constant 13 : i32
    %26 = vector.broadcast %c13_i32 : i32 to vector<8x1xi32>
    %27 = arith.cmpi slt, %25, %26 : vector<8x1xi32>
    %cst_7 = arith.constant 0.000000e+00 : f32
    %28 = vector.broadcast %cst_7 : f32 to vector<8x1xf32>
    %29 = arith.select %27, %21, %28 : vector<8x1xi1>, vector<8x1xf32>
    %30 = vector.shape_cast %29 : vector<8x1xf32> to vector<1x8x1xf32>
    %cst_8 = arith.constant dense<0.000000e+00> : vector<1xf32>
    %31 = vector.multi_reduction <add>, %30, %cst_8 [1, 2] : vector<1x8x1xf32> to vector<1xf32>
    %32 = vector.shape_cast %31 : vector<1xf32> to vector<1x1x1xf32>
    %33 = vector.extract %32[0, 0, 0] : f32 from vector<1x1x1xf32>
    %34 = vector.broadcast %33 : f32 to vector<1x8x128xf32>
    %c0_9 = arith.constant 0 : index
    %c0_10 = arith.constant 0 : index
    %c0_11 = arith.constant 0 : index
    %35 = vector.load %arg3[%c0_9, %c0_10, %c0_11] : memref<1x8x128xf32, #tpu.memory_space<vmem>>, vector<1x8x128xf32>
    tpu.vector_store %arg3[%c0_9, %c0_10, %c0_11], %34 {strides = array<i32>} : memref<1x8x128xf32, #tpu.memory_space<vmem>>, vector<1x8x128xf32>,
    return
  }
  func.func @transform_0(%arg0: i32) -> (i32, i32) {
    %c0_i32 = arith.constant 0 : i32
    %c0_i32_0 = arith.constant 0 : i32
    return %arg0, %c0_i32 : i32, i32
  }
  func.func @transform_1(%arg0: i32) -> (i32, i32) {
    %c0_i32 = arith.constant 0 : i32
    %c0_i32_0 = arith.constant 0 : i32
    %c0_i32_1 = arith.constant 0 : i32
    return %c0_i32, %c0_i32_0 : i32, i32
  }
  func.func @transform_2(%arg0: i32) -> (i32, i32, i32) {
    %c0_i32 = arith.constant 0 : i32
    %c0_i32_0 = arith.constant 0 : i32
    %c0_i32_1 = arith.constant 0 : i32
    return %arg0, %c0_i32, %c0_i32_0 : i32, i32, i32
  }
}

</mosaic_0001>

<bundles_post_ra>
// kernel: tpu_custom_call.1
= control target key start
LH: loop header
LB: loop body
LE: loop exit
PB: predicated region body
PF: predicated region fallthrough
CT: control target
= control target key end

     0   :  { %7 = vsyncpa [#allocation3], 0  ;;  %s497_s0 = inlined_call_operand.vmem [shape: f32[13,32], index: 0, kind: input, shape index: {}]   ;;  %s498_s1 = inlined_call_operand.vmem [shape: f32[16,1], index: 1, kind: input, shape index: {}]   ;;  %s499_s2 = inlined_call_operand.hbm [shape: f32[2,8,128], index: 2, kind: output, shape index: {}]  }
   0x1   :  { %9 = vsyncpa [#allocation3 + $0x1], 0  ;;  %s393_s9 = smov 0   ;;  %s395_s10 = smov 0  }
   0x2   :  { %s397_s11 = smov 0   ;;  %s399_s12 = smov 0  }
   0x3 LB: > { %s414_s13 = sadd.s32 4294967295, %s375_s12   ;;  %s257_s14 = sadd.s32 4294967294, %s375_s12   ;;  %s375_s12 = sphi %s399_s12, %s505_s12   ;;  %s371_s11 = sphi %s397_s11, %s504_s11   ;;  %s367_s10 = sphi %s395_s10, %s503_s10   ;;  %s363_s9 = sphi %s393_s9, %s502_s9  }
   0x4   : > { %s418_s15 = sadd.s32 1, %s375_s12   ;;  %s69_s16 = sadd.s32 1, %s371_s11 }
   0x5   : > { %s66_s17 = ssub.s32 %s375_s12, %s418_s15  ;;  %p79_p0 = scmp.ne.s32.totalorder %s371_s11, %s367_s10 }
   0x6   : > { %p67_p1 = scmp.eq.s32.totalorder %s66_s17, 0  ;;  %p80_p2 = scmp.eq.s32.totalorder %s414_s13, 1 }
   0x7   : > { %p85_p3 = scmp.ne.s32.totalorder %s367_s10, %s363_s9  ;;  %p86_p4 = scmp.eq.s32.totalorder %s257_s14, 1 }
   0x8   : > { %s429_s18 = scalar_select %p67_p1, %s371_s11, %s69_s16  }
   0x9   : > { %p431_p5 = por %p80_p2, %p79_p0  ;;  %p435_p6 = por %p86_p4, %p85_p3 }
   0xa   : > { %p260_p7 = scmp.ge.s32.totalorder %s375_s12, 1  ;;  %p114_p8 = scmp.lt.s32.totalorder %s375_s12, 3 }
   0xc   : > { %p115_p9 = pnand %p260_p7, %p114_p8 }
   0xd   : > { %p135_p10 = scmp.lt.s32.totalorder (!%p115_p9), %s414_s13, 1  ;;  %vm140_vm0 = vcmask (!%p115_p9), 261120   ;;  %s263_s26 = sshll.u32 (!%p115_p9), %s414_s13, 3  ;;  %v163_v9 = vlaneseq (!%p115_p9)  ;;  %vm169_vm2 = vcmask (!%p115_p9), 7168  }
   0xe   : > { %118 = sbr.rel (%p115_p9) target bundleno = 565 (0x235), region = 28  ;;  %s156_s29 = scalar_lea.vmem (!%p115_p9), %s498_s1, %s263_s26  ;;  %v165_v13 = vstv (!%p115_p9), %s263_s26 }
   0xf   : > { %v157_v10 = vld [vmem:[%s156_s29] sm:$0xff] (!%p115_p9)  ;;  %v164_v11 = vshrl.u32 (!%p115_p9), %v163_v9, 7  ;;  %s132_s30 = sand.u32 (!%p115_p9), 1, %s367_s10   ;;  %s265_s6 = sshll.u32 (!%p115_p9), %s414_s13, 7 }
  0x10   : > { %s261_s3 = sshll.u32 (!%p115_p9), %s132_s30, 3  ;;  %s457_s16 = scalar_lea.hbm (!%p115_p9), %s499_s2, %s265_s6 }
  0x11   : > { %v166_v16 = vadd.s32 (!%p115_p9), %v165_v13, %v164_v11  ;;  %s134_s4 = scalar_lea.vmem (!%p115_p9), [#allocation2], %s261_s3  ;;  %s183_s17 = scalar_lea.sflag (!%p115_p9), [#allocation3], %s132_s30 }
  0x12   : > { %s196_s5 = sshll.u32 (!%p115_p9), %s134_s4, 4  ;;  %s452_s5 = int_to_ptr.vmem [resolvable:$true] %s196_s5 }
  0x13   : > { %vm167_vm1 = vcmp.lt.s32.totalorder (!%p115_p9), %v166_v16, 13 }
  0x15   : > { %s136_s21 = scalar_select %p135_p10, %s414_s13, 1 }
  0x16   : > { %s377_s13 = smov [#allocation2]  }
  0x17   : > { %s262_s22 = sshll.u32 %s136_s21, 3  ;;  %s313_s21 = scalar_lea.vmem %s452_s5, 128 }
  0x18   : > { %s138_s25 = scalar_lea.vmem %s497_s0, %s262_s22  ;;  %p314_p11 = scmp.ne.s32.totalorder %s452_s5, %s313_s21 }
  0x19   : > { %v139_v0 = vld [vmem:[%s138_s25] sm:$0xff]  ;;  %s317_s22 = sshll.u32 %s377_s13, 4  ;;  %s318_s22 = int_to_ptr.vmem [resolvable:$false] %s317_s22 }
  0x1a   : > { %v141_v1 = vsel %vm140_vm0, %v139_v0, -inf  ;;  %p315_p12 = pnand %p314_p11, %p431_p5  ;;  %s319_s23 = scalar_lea.vmem %s318_s22, 256 }
  0x1b   : > { %142 = vmax.xlane.f32.xlu0 %v141_v1  ;;  %p320_p0 = scmp.lt.s32.totalorder %s452_s5, %s318_s22  ;;  %p321_p1 = scmp.lt.s32.totalorder %s319_s23, %s313_s21 }
  0x1c   : > { %p316_p13 = pneg %p315_p12 }
  0x1d   : > { %p322_p2 = por %p321_p1, %p320_p0 }
  0x1f   : > { %p323_p3 = pnand %p322_p2, %p316_p13 }
  0xa8   : > { %v143_v2 = vpop.xlane.xlu0 %142 }
  0xa9   : > { %v144_v3 = vsub.f32 %v139_v0, %v143_v2  ;;  %v158_v12 = vsub.f32 %v157_v10, %v143_v2 }
  0xab   : > { %v152_v4 = vsel %vm140_vm0, %v144_v3, 0.0  ;;  %v145_v5 = vmul.f32 1.442695, %v144_v3  ;;  %v159_v17 = vmul.f32 0.9, %v158_v12 }
  0xac   : > { %153 = vadd.xlane.f32.xlu1 %v152_v4 }
  0xad   : > { %309 = vpow2.f32 %v145_v5 }
  0xb7   : > { %v310_v6 = vpop.eup %309 }
  0xb8   : > { %v147_v7 = vsel %vm140_vm0, %v310_v6, 0.0 }
  0xb9   : > { %148 = vadd.xlane.f32.xlu0 %v147_v7 }
 0x139   : > { %v154_v15 = vpop.xlane.xlu1 %153 }
 0x13a   : > { %v161_v19 = vmul.f32 0.003125, %v154_v15 }
 0x146   : > { %v149_v8 = vpop.xlane.xlu0 %148 }
 0x147   : > { %311 = vlog2.f32 %v149_v8 }
 0x151   : > { %v312_v14 = vpop.eup %311 }
 0x152   : > { %v151_v18 = vmul.f32 0.6931472, %v312_v14 }
 0x154   : > { %v160_v20 = vsub.f32 %v151_v18, %v159_v17 }
 0x156   : > { %v162_v21 = vsub.f32 %v160_v20, %v161_v19 }
 0x158   : > { %v168_v22 = vsel %vm167_vm1, %v162_v21, 0.0 }
 0x159   : > { %v170_v23 = vsel %vm169_vm2, %v168_v22, 0.0 }
 0x15a   : > { %171 = vadd.xlane.f32.xlu1 %v170_v23 }
 0x1e7   : > { %v172_v24 = vpop.xlane.xlu1 %171 }
 0x1e8   : > { %v173_v25 = vrot.slane %v172_v24, 4 }
 0x1ea   : > { %v174_v26 = vadd.f32 %v173_v25, %v172_v24 }
 0x1ec   : > { %v175_v27 = vrot.slane %v174_v26, 2 }
 0x1ee   : > { %v176_v28 = vadd.f32 %v175_v27, %v174_v26 }
 0x1f0   : > { %v177_v29 = vrot.slane %v176_v28, 1 }
 0x1f2   : > { %v178_v30 = vadd.f32 %v177_v29, %v176_v28 }
 0x1f4   : > { %268 = vpush %v178_v30 }
 0x225   : > { %s269_s7 = spop %268 }
 0x226   : > { %v180_v31 = vstv %s269_s7 }
 0x227   : > { %181 = vst [vmem:[%s134_s4] sm:$0xff] %v180_v31 }
 0x228   : > { %326 = shalt.err (!%p323_p3)
}
 0x229   : > { %s327_s24 = scalar_lea.hbm %s457_s16, 128  ;;  %s331_s27 = scalar_lea.hbm %s499_s2, 256 }
 0x22a   : > { %p328_p4 = scmp.ne.s32.totalorder %s457_s16, %s327_s24  ;;  %p332_p9 = scmp.lt.u32.totalorder %s457_s16, %s499_s2 }
 0x22b   : > { %p333_p10 = scmp.lt.u32.totalorder %s331_s27, %s327_s24  ;;  %p335_p12 = scmp.lt.u32.totalorder %s327_s24, %s457_s16 }
 0x22c   : > { %p329_p7 = pnand %p328_p4, %p431_p5 }
 0x22d   : > { %p334_p11 = por %p333_p10, %p332_p9 }
 0x22e   : > { %p330_p8 = pneg %p329_p7 }
 0x22f   : > { %p336_p13 = por %p335_p12, %p334_p11 }
 0x231   : > { %p337_p0 = pnand %p336_p13, %p330_p8 }
 0x233   : > { %340 = shalt.err (!%p337_p0)
}
 0x234   : > { %270 = dma.vmem_to_hbm [thread:$0]  (%p431_p5), %s452_s5, 128, %s457_s16, %s183_s17  }
 0x235 PF: > { %p276_p1 = scmp.ge.s32.totalorder %s375_s12, 2  ;;  %s208_s30 = sand.u32 1, %s363_s9  }
 0x236   : > { %s209_s3 = scalar_lea.sflag [#allocation3], %s208_s30 }
 0x237   : > { %p273_p2 = pnand %p276_p1, %p435_p6 }
 0x239   : > { %358 = dma.done.wait (!%p273_p2), %s209_s3, 128  }
 0x23a   : > { %360 = vsyncadd (!%p273_p2), %s209_s3, 4294967168  ;;  %p12_p3 = scmp.ge.s32.totalorder %s418_s15, 4   ;;  %s502_s9 = smov %s367_s10 }
 0x23b   : > { %s503_s10 = smov %s371_s11  ;;  %s504_s11 = smov %s429_s18 }
 0x23c   : > { %s505_s12 = smov %s418_s15  ;;  %14 = sbr.rel (!%p12_p3) target bundleno = 3 (0x3), region = 64 }
 0x243   :  { %214 = vsyncpa [#allocation3], 1 }
 0x244   :  { %216 = vsyncpa [#allocation3 + $0x1], 1 }

</bundles_post_ra>
